<compile_context>
chip_gen: v5e
topology: v5e:2x2
jax: 0.10.0
libtpu: 0.0.40
codegen_flags: <defaults>
</compile_context>

<pallas_src>
import functools

import jax
import jax.numpy as jnp
from jax.experimental import pallas as pl
from jax.experimental.pallas import tpu as pltpu


def _round_up(a, b):
    return (a + b - 1) // b * b


def _pad_gate_axis(w, h, hp, axis):
    """`w` has 4*h along `axis` in gate order [i, f, g, o]; pad each gate to hp."""
    if hp == h:
        return w
    parts = jnp.split(w, 4, axis=axis)
    pad = [(0, 0)] * w.ndim
    pad[axis] = (0, hp - h)
    return jnp.concatenate([jnp.pad(p, pad) for p in parts], axis=axis)


# --------------------------------------------------------------------------
# Phase 1: hoisted input projection  gx[t, b, :] = x[t, b, :] @ W_ih^T + bias
#   bf16 MXU operands, f32 accumulation, bf16 output.
# --------------------------------------------------------------------------
def input_proj_kernel(x_ref, w_ref, b_ref, gx_ref):
    acc = jnp.dot(x_ref[...], w_ref[...], preferred_element_type=jnp.float32)
    gx_ref[...] = (acc + b_ref[...]).astype(gx_ref.dtype)


def _input_projection(x2, wih_t, bias, *, tm, tn):
    rows, in_dim = x2.shape
    four_hp = wih_t.shape[1]
    return pl.pallas_call(
        input_proj_kernel,
        out_shape=jax.ShapeDtypeStruct((rows, four_hp), jnp.bfloat16),
        grid_spec=pltpu.PrefetchScalarGridSpec(
            num_scalar_prefetch=0,
            grid=(rows // tm, four_hp // tn),
            in_specs=[
                pl.BlockSpec((tm, in_dim), lambda r, n: (r, 0)),   # x row tile (bf16)
                pl.BlockSpec((in_dim, tn), lambda r, n: (0, n)),   # W_ih^T N-tile (bf16)
                pl.BlockSpec((1, tn), lambda r, n: (0, n)),        # fused bias (f32)
            ],
            out_specs=pl.BlockSpec((tm, tn), lambda r, n: (r, n)),
        ),
        compiler_params=pltpu.CompilerParams(
            dimension_semantics=("parallel", "parallel"),
            vmem_limit_bytes=48 * 1024 * 1024,
        ),
    )(x2, wih_t, bias)


# --------------------------------------------------------------------------
# Phase 2: sequential recurrence over chunks of Tc timesteps.
# --------------------------------------------------------------------------
def lstm_chunk_kernel(maxlen_ref,                      # scalar prefetch (SMEM), (nb,)
                      gx_ref, len_ref, whh_ref,        # inputs
                      out_ref, hT_ref, cT_ref,         # outputs
                      h_scr, c_scr,                    # scratch carries (f32)
                      *, hidden_p, chunk):
    Hp = hidden_p
    b_idx = pl.program_id(0)
    t_idx = pl.program_id(1)
    t0 = t_idx * chunk

    @pl.when(t_idx == 0)
    def _():
        h_scr[...] = jnp.zeros_like(h_scr)
        c_scr[...] = jnp.zeros_like(c_scr)

    max_len = maxlen_ref[b_idx]          # per-batch-block max length

    @pl.when(t0 >= max_len)
    def _():
        # Every sequence in this batch block has finished: zero outputs, freeze state.
        out_ref[...] = jnp.zeros_like(out_ref)

    @pl.when(t0 < max_len)
    def _():
        lens = len_ref[...]              # (bb, 1) int32
        whh = whh_ref[...]               # (Hp, 4Hp) bf16, resident

        def step(tt, carry):
            h, c = carry                 # f32 (bb, Hp)
            # Input contribution precomputed (bf16); one bf16 MXU push per step.
            gates = gx_ref[tt].astype(jnp.float32) + jnp.dot(
                h.astype(jnp.bfloat16), whh, preferred_element_type=jnp.float32)
            i_g = jax.nn.sigmoid(gates[:, 0 * Hp:1 * Hp])
            f_g = jax.nn.sigmoid(gates[:, 1 * Hp:2 * Hp])
            g_g = jnp.tanh(gates[:, 2 * Hp:3 * Hp])
            o_g = jax.nn.sigmoid(gates[:, 3 * Hp:4 * Hp])
            c_new = f_g * c + i_g * g_g
            h_new = o_g * jnp.tanh(c_new)
            # pack_padded_sequence semantics: freeze state / zero output past len.
            # Single mask broadcast per step, reused three times (arith blending).
            valid = jnp.broadcast_to(
                (lens > (t0 + tt)).astype(jnp.float32), h_new.shape)
            h_nxt = h + valid * (h_new - h)
            c_nxt = c + valid * (c_new - c)
            out_ref[tt] = (valid * h_new).astype(out_ref.dtype)
            return h_nxt, c_nxt

        h_fin, c_fin = jax.lax.fori_loop(
            0, chunk, step, (h_scr[...], c_scr[...]), unroll=True)
        h_scr[...] = h_fin
        c_scr[...] = c_fin

    # Write the resident h_n / c_n outputs only once, on the last time chunk.
    @pl.when(t_idx == pl.num_programs(1) - 1)
    def _():
        hT_ref[0] = h_scr[...].astype(hT_ref.dtype)
        cT_ref[0] = c_scr[...].astype(cT_ref.dtype)


def rnn_encoder_forward(x, lengths, w_ih, w_hh, b_ih, b_hh, *, chunk=32):
    """x: (T, B, I); lengths: (B,) int; weights in PyTorch layout:
       w_ih (4H, I), w_hh (4H, H), b_ih/b_hh (4H,)."""
    T, B, I = x.shape
    H = w_hh.shape[1]
    Hp = _round_up(H, 128)            # lane-aligned hidden size
    four_hp = 4 * Hp

    # --- one-time weight prep (plain JAX glue): pad gates to Hp, transpose,
    #     fuse biases, cast MXU operands to bf16.
    wih_p = _pad_gate_axis(w_ih.astype(jnp.float32), H, Hp, axis=0)      # (4Hp, I)
    wih_t = jnp.transpose(wih_p).astype(jnp.bfloat16)                    # (I, 4Hp)
    whh_p = _pad_gate_axis(w_hh.astype(jnp.float32), H, Hp, axis=0)      # (4Hp, H)
    whh_p = jnp.pad(whh_p, ((0, 0), (0, Hp - H)))                        # (4Hp, Hp)
    whh_t = jnp.transpose(whh_p).astype(jnp.bfloat16)                    # (Hp, 4Hp)
    bias = _pad_gate_axis((b_ih + b_hh).astype(jnp.float32), H, Hp, axis=0)
    bias = bias.reshape(1, four_hp)                                      # (1, 4Hp) f32

    lengths = lengths.astype(jnp.int32)

    # ---- Phase 1: one big GEMM over all (T*B) rows, tiled over rows and 4Hp.
    rows = T * B
    tm = 512 if rows >= 512 else _round_up(rows, 8)
    rows_p = _round_up(rows, tm)
    tn = min(512, four_hp)                      # four_hp is a multiple of 512
    x2 = x.reshape(rows, I).astype(jnp.bfloat16)
    if rows_p != rows:
        x2 = jnp.pad(x2, ((0, rows_p - rows), (0, 0)))
    gx = _input_projection(x2, wih_t, bias, tm=tm, tn=tn)[:rows]
    gx = gx.reshape(T, B, four_hp)              # bf16

    # ---- Batch split: only worthwhile on multi-TC parts with a large batch
    #      (each shard must still fill the MXU M dimension).  Never split on
    #      single-TC v5e/v6e sizes.
    nb = 2 if (B >= 512 and B % 2 == 0) else 1
    bb = B // nb
    lengths2d = lengths.reshape(B, 1)
    block_maxlen = jnp.max(lengths.reshape(nb, bb), axis=1)   # (nb,) -> SMEM

    # ---- Chunk size from an explicit VMEM budget (fits v7x's 64 MiB VMEM).
    def _need(tc_):
        return (2 * tc_ * bb * four_hp * 2      # double-buffered bf16 gx chunk
                + 2 * tc_ * bb * Hp * 4         # double-buffered f32 out chunk
                + Hp * four_hp * 2              # resident bf16 W_hh
                + 2 * bb * Hp * 4               # f32 h/c carries
                + 1024)                         # lengths / misc
    budget = 40 * 1024 * 1024
    tc = max(1, min(chunk, T))
    while tc > 1 and _need(tc) > budget:
        tc = max(1, tc // 2)
    t_pad = _round_up(T, tc)
    if t_pad != T:
        gx = jnp.pad(gx, ((0, t_pad - T), (0, 0), (0, 0)))
    nt = t_pad // tc
    vmem_limit = int(min(max(32 * 1024 * 1024, 2 * _need(tc)),
                         48 * 1024 * 1024))

    kernel = functools.partial(lstm_chunk_kernel, hidden_p=Hp, chunk=tc)

    out_shapes = (
        jax.ShapeDtypeStruct((t_pad, B, Hp), jnp.float32),   # outputs (padded T, Hp)
        jax.ShapeDtypeStruct((1, B, Hp), jnp.float32),       # h_n
        jax.ShapeDtypeStruct((1, B, Hp), jnp.float32),       # c_n
    )

    outputs_p, h_n, c_n = pl.pallas_call(
        kernel,
        out_shape=out_shapes,
        grid_spec=pltpu.PrefetchScalarGridSpec(
            num_scalar_prefetch=1,                            # per-block maxlen -> SMEM
            grid=(nb, nt),
            in_specs=[
                pl.BlockSpec((tc, bb, four_hp), lambda b, t, ml: (t, b, 0)),  # gx chunk
                pl.BlockSpec((bb, 1), lambda b, t, ml: (b, 0)),               # lengths
                pl.BlockSpec((Hp, four_hp), lambda b, t, ml: (0, 0)),         # W_hh^T
            ],
            out_specs=[
                pl.BlockSpec((tc, bb, Hp), lambda b, t, ml: (t, b, 0)),       # outputs
                pl.BlockSpec((1, bb, Hp), lambda b, t, ml: (0, b, 0)),        # h_n (resident)
                pl.BlockSpec((1, bb, Hp), lambda b, t, ml: (0, b, 0)),        # c_n (resident)
            ],
            scratch_shapes=[
                pltpu.VMEM((bb, Hp), jnp.float32),   # h carry
                pltpu.VMEM((bb, Hp), jnp.float32),   # c carry
            ],
        ),
        compiler_params=pltpu.CompilerParams(
            dimension_semantics=("parallel", "arbitrary"),
            vmem_limit_bytes=vmem_limit,
        ),
    )(block_maxlen, gx, lengths2d, whh_t)

    outputs = outputs_p[:T, :, :H].astype(x.dtype)
    h_n = h_n[:, :, :H].astype(x.dtype)
    c_n = c_n[:, :, :H].astype(x.dtype)
    return outputs, (h_n, c_n)


# --------------------------------------------------------------------------
# Pure-JAX reference (lax.scan, f32) of the packed single-layer LSTM.
# --------------------------------------------------------------------------
def reference_forward(x, lengths, w_ih, w_hh, b_ih, b_hh):
    T, B, I = x.shape
    H = w_hh.shape[1]
    bias = b_ih + b_hh

    def step(carry, inp):
        h, c = carry
        x_t, t = inp
        gates = x_t @ w_ih.T + h @ w_hh.T + bias
        i_g = jax.nn.sigmoid(gates[:, 0 * H:1 * H])
        f_g = jax.nn.sigmoid(gates[:, 1 * H:2 * H])
        g_g = jnp.tanh(gates[:, 2 * H:3 * H])
        o_g = jax.nn.sigmoid(gates[:, 3 * H:4 * H])
        c_new = f_g * c + i_g * g_g
        h_new = o_g * jnp.tanh(c_new)
        valid = (lengths > t)[:, None]
        h_next = jnp.where(valid, h_new, h)
        c_next = jnp.where(valid, c_new, c)
        out_t = jnp.where(valid, h_new, 0.0)
        return (h_next, c_next), out_t

    init = (jnp.zeros((B, H), jnp.float32), jnp.zeros((B, H), jnp.float32))
    (h_n, c_n), outs = jax.lax.scan(step, init, (x, jnp.arange(T)))
    return outs, (h_n[None], c_n[None])


if __name__ == "__main__":
    # Small shapes consistent with the module: seq T=8, batch B=2, input I=16, hidden H=32.
    T, B, I, H = 8, 2, 16, 32

    key = jax.random.PRNGKey(0)
    kx, k1, k2, k3, k4 = jax.random.split(key, 5)

    x = jax.random.normal(kx, (T, B, I), dtype=jnp.float32)
    lengths = jnp.array([8, 5], dtype=jnp.int32)   # variable lengths -> pack/unpack path

    # Deterministic parameter init (PyTorch LSTM layout: uniform(-1/sqrt(H), 1/sqrt(H))).
    bound = 1.0 / jnp.sqrt(jnp.float32(H))
    w_ih = jax.random.uniform(k1, (4 * H, I), jnp.float32, -bound, bound)
    w_hh = jax.random.uniform(k2, (4 * H, H), jnp.float32, -bound, bound)
    b_ih = jax.random.uniform(k3, (4 * H,), jnp.float32, -bound, bound)
    b_hh = jax.random.uniform(k4, (4 * H,), jnp.float32, -bound, bound)

    outputs, (h_n, c_n) = rnn_encoder_forward(x, lengths, w_ih, w_hh, b_ih, b_hh)
    jax.block_until_ready((outputs, h_n, c_n))

    ref_out, (ref_h, ref_c) = reference_forward(x, lengths, w_ih, w_hh, b_ih, b_hh)

    assert outputs.shape == (T, B, H)
    assert h_n.shape == (1, B, H) and c_n.shape == (1, B, H)
    # bf16 MXU operands vs. the f32 reference: use a looser tolerance.
    assert jnp.allclose(outputs, ref_out, atol=5e-2), "outputs mismatch"
    assert jnp.allclose(h_n, ref_h, atol=5e-2), "h_n mismatch"
    assert jnp.allclose(c_n, ref_c, atol=5e-2), "c_n mismatch"

    print("KERNEL_OK")
</pallas_src>

<mosaic_0001>
module attributes {stable_mosaic.version = 11 : i64} {
  func.func @input_proj_kernel(%arg0: i32, %arg1: i32, %arg2: memref<16x16xbf16, #tpu.memory_space<vmem>>, %arg3: memref<16x512xbf16, #tpu.memory_space<vmem>>, %arg4: memref<1x512xf32, #tpu.memory_space<vmem>>, %arg5: memref<16x512xbf16, #tpu.memory_space<vmem>>) attributes {dimension_semantics = [#tpu.dimension_semantics<parallel>, #tpu.dimension_semantics<parallel>], iteration_bounds = array<i64: 1, 1>, scalar_prefetch = 0 : i64, scratch_operands = 0 : i64, tpu.core_type = #tpu.core_type<tc>, window_params = [{transform_indices = @transform_0, window_bounds = array<i64: 16, 16>}, {transform_indices = @transform_1, window_bounds = array<i64: 16, 512>}, {transform_indices = @transform_2, window_bounds = array<i64: 1, 512>}, {transform_indices = @transform_3, window_bounds = array<i64: 16, 512>}]} {
    %c0 = arith.constant 0 : index
    %c0_0 = arith.constant 0 : index
    %0 = vector.load %arg2[%c0, %c0_0] : memref<16x16xbf16, #tpu.memory_space<vmem>>, vector<16x16xbf16>
    %c0_1 = arith.constant 0 : index
    %c0_2 = arith.constant 0 : index
    %1 = vector.load %arg3[%c0_1, %c0_2] : memref<16x512xbf16, #tpu.memory_space<vmem>>, vector<16x512xbf16>
    %cst = arith.constant dense<0.000000e+00> : vector<16x512xf32>
    %2 = tpu.matmul %0, %1, %cst {dimension_numbers = #tpu.dot_dimension_numbers<[1], [0], [0], [1], [0, 0, 1, 1], [], []>} : vector<16x16xbf16>, vector<16x512xbf16>, vector<16x512xf32> -> vector<16x512xf32>
    %c0_3 = arith.constant 0 : index
    %c0_4 = arith.constant 0 : index
    %3 = vector.load %arg4[%c0_3, %c0_4] : memref<1x512xf32, #tpu.memory_space<vmem>>, vector<1x512xf32>
    %4 = vector.broadcast %3 : vector<1x512xf32> to vector<16x512xf32>
    %5 = arith.addf %2, %4 : vector<16x512xf32>
    %6 = arith.truncf %5 : vector<16x512xf32> to vector<16x512xbf16>
    %c0_5 = arith.constant 0 : index
    %c0_6 = arith.constant 0 : index
    %7 = vector.load %arg5[%c0_5, %c0_6] : memref<16x512xbf16, #tpu.memory_space<vmem>>, vector<16x512xbf16>
    tpu.vector_store %arg5[%c0_5, %c0_6], %6 {strides = array<i32>} : memref<16x512xbf16, #tpu.memory_space<vmem>>, vector<16x512xbf16>,
    return
  }
  func.func @transform_0(%arg0: i32, %arg1: i32) -> (i32, i32) {
    %c0_i32 = arith.constant 0 : i32
    %c0_i32_0 = arith.constant 0 : i32
    return %arg0, %c0_i32 : i32, i32
  }
  func.func @transform_1(%arg0: i32, %arg1: i32) -> (i32, i32) {
    %c0_i32 = arith.constant 0 : i32
    %c0_i32_0 = arith.constant 0 : i32
    return %c0_i32, %arg1 : i32, i32
  }
  func.func @transform_2(%arg0: i32, %arg1: i32) -> (i32, i32) {
    %c0_i32 = arith.constant 0 : i32
    %c0_i32_0 = arith.constant 0 : i32
    return %c0_i32, %arg1 : i32, i32
  }
  func.func @transform_3(%arg0: i32, %arg1: i32) -> (i32, i32) {
    %c0_i32 = arith.constant 0 : i32
    return %arg0, %arg1 : i32, i32
  }
}

</mosaic_0001>

<bundles_post_ra>
// kernel: tpu_custom_call.1
= control target key start
LH: loop header
LB: loop body
LE: loop exit
PB: predicated region body
PF: predicated region fallthrough
CT: control target
= control target key end

     0   :  { %8 = vsyncpa [#allocation3], 0  ;;  %s375_s0 = inlined_call_operand.hbm [shape: bf16[16,16], index: 0, kind: input, shape index: {}]   ;;  %s376_s1 = inlined_call_operand.hbm [shape: bf16[16,512], index: 1, kind: input, shape index: {}]   ;;  %s377_s2 = inlined_call_operand.hbm [shape: f32[1,512], index: 2, kind: input, shape index: {}]   ;;  %s378_s3 = inlined_call_operand.hbm [shape: bf16[16,512], index: 3, kind: output, shape index: {}]  }
   0x1   :  { %9 = vsyncpa [#allocation6], 0  ;;  %s28_s14 = sshll.u32 %s376_s1, 4  ;;  %s29_s14 = int_to_ptr.hbm [resolvable:$true] %s28_s14 }
   0x2   :  { %10 = vsyncpa [#allocation4], 0  ;;  %s329_s15 = smov [#allocation5]   ;;  %s15_s19 = sshll.u32 %s375_s0, 4  ;;  %s16_s19 = int_to_ptr.hbm [resolvable:$true] %s15_s19 }
   0x3   :  { %s30_s16 = sshll.u32 %s329_s15, 4  ;;  %s330_s20 = smov 256   ;;  %s31_s16 = int_to_ptr.vmem [resolvable:$true] %s30_s16 }
   0x4   :  { %s331_s21 = smov 16   ;;  %s332_s22 = smov [#allocation2]  }
   0x5   :  { %36 = dma.hbm_to_vmem [thread:$0]  %s29_s14, 512, %s31_s16, [#allocation6], %s330_s20, %s330_s20, %s331_s21  }
   0x6   :  { %s17_s23 = sshll.u32 %s332_s22, 4  ;;  %s333_s1 = smov 64   ;;  %s18_s23 = int_to_ptr.vmem [resolvable:$true] %s17_s23 }
   0x7   :  { %s334_s24 = smov 4   ;;  %s42_s27 = sshll.u32 %s377_s2, 4  ;;  %s43_s27 = int_to_ptr.hbm [resolvable:$true] %s42_s27 }
   0x8   :  { %23 = dma.hbm_to_vmem [thread:$0]  %s16_s19, 128, %s18_s23, [#allocation3], %s333_s1, %s333_s1, %s334_s24  }
   0x9   :  { %s335_s28 = smov [#allocation7]  }
   0xa   :  { %s44_s0 = sshll.u32 %s335_s28, 4  ;;  %s45_s0 = int_to_ptr.vmem [resolvable:$true] %s44_s0 }
   0xb   :  { %47 = dma.hbm_to_vmem [thread:$0]  %s43_s27, 64, %s45_s0, [#allocation6]  }
   0xc   :  { %323 = dma.done.wait [#allocation3], 128  }
   0xd   :  { %324 = vsyncadd [#allocation3], 4294967168 }
   0xe   :  { %325 = dma.done.wait [#allocation6], 576  }
   0xf   :  { %326 = vsyncadd [#allocation6], 4294966720  ;;  %v196_v0 = vld [vmem:[#allocation5] sm:$0xf]  ;;  %v217_v1 = vld [vmem:[#allocation5 + $0xc] sm:$0xf0] }
  0x10   :  { %v215_v2 = vld [vmem:[#allocation5 + $0x4] sm:$0xf]  ;;  %v197_v3 = vor.u32 %v217_v1, %v196_v0  ;;  %v198_v4 = vld [vmem:[#allocation5 + $0x10] sm:$0xf0]  ;;  %v204_v5 = vld [vmem:[#allocation5 + $0x8] sm:$0xf] }
  0x11   :  { %v218_v6 = vld [vmem:[#allocation5 + $0x14] sm:$0xf0]  ;;  %v201_v7 = vor.u32 %v215_v2, %v198_v4  ;;  %v216_v9 = vld [vmem:[#allocation5 + $0xc] sm:$0xf]  ;;  %v206_v10 = vld [vmem:[#allocation5 + $0x18] sm:$0xf0] }
  0x12   :  { %v205_v8 = vor.u32 %v218_v6, %v204_v5  ;;  %v214_v11 = vld [vmem:[#allocation2] sm:$0xff]  ;;  %113 = vmatpush.bf16.msra.mxu0 %v197_v3  ;;  %v209_v12 = vor.u32 %v216_v9, %v206_v10  ;;  %vm102_vm0 = vcmask 130048   ;;  %v67_v13 = vld [vmem:[#allocation7] sm:$0xf]  ;;  %s336_s2 = smov [#allocation8]   ;;  %s176_s5 = sshll.u32 %s378_s3, 4  ;;  %s177_s5 = int_to_ptr.hbm [resolvable:$true] %s176_s5 }
  0x13   :  { %127 = vmatpush.bf16.msra.mxu1 %v201_v7  ;;  %v69_v14 = vperm.slane %v67_v13, 0  ;;  %v70_v15 = vperm.slane %v67_v13, 1  ;;  %v71_v21 = vperm.slane %v67_v13, 2  ;;  %v72_v22 = vperm.slane %v67_v13, 3  ;;  %s174_s29 = sshll.u32 %s336_s2, 4  ;;  %s175_s29 = int_to_ptr.vmem [resolvable:$true] %s174_s29 }
  0x14   :  { %141 = vmatpush.bf16.msra.mxu2 %v205_v8  ;;  %155 = vmatpush.bf16.msra.mxu3 %v209_v12 }
  0x15   :  { %210 = vmatmul.msk.bf16.vlgmr.msra.gmra.mxu0 %vm102_vm0, %v214_v11 }
  0x16   :  { %211 = vmatmul.msk.bf16.vlgmr.msra.gmra.mxu1 %vm102_vm0, %v214_v11 }
  0x17   :  { %212 = vmatmul.msk.bf16.vlgmr.msra.gmra.mxu2 %vm102_vm0, %v214_v11  ;;  %213 = vmatmul.msk.bf16.vlgmr.msra.gmra.mxu3 %vm102_vm0, %v214_v11 }
  0x92   :  { %v115_v16 = vpop.f32.mrf.mxu0 }
  0x93   :  { %v116_v17 = vadd.f32 %v115_v16, %v69_v14  ;;  %v129_v18 = vpop.f32.mrf.mxu1 }
  0x94   :  { %v130_v19 = vadd.f32 %v129_v18, %v70_v15 }
  0x96   :  { %v162_v20 = vpack.c.bf16 %v130_v19, %v116_v17 }
  0x98   :  { %166 = vst [vmem:[#allocation8] sm:$0xff] %v162_v20 }
  0x9a   :  { %v143_v23 = vpop.f32.mrf.mxu2  ;;  %v157_v25 = vpop.f32.mrf.mxu3 }
  0x9b   :  { %v144_v24 = vadd.f32 %v143_v23, %v71_v21  ;;  %v117_v26 = vpop.f32.mrf.mxu0  ;;  %v158_v27 = vadd.f32 %v157_v25, %v72_v22  ;;  %v131_v29 = vpop.f32.mrf.mxu1 }
  0x9c   :  { %v118_v28 = vadd.f32 %v117_v26, %v69_v14  ;;  %v132_v30 = vadd.f32 %v131_v29, %v70_v15 }
  0x9d   :  { %v163_v31 = vpack.c.bf16 %v158_v27, %v144_v24 }
  0x9e   :  { %v164_v32 = vpack.c.bf16 %v132_v30, %v118_v28 }
  0x9f   :  { %167 = vst [vmem:[#allocation8 + $0x8] sm:$0xff] %v163_v31 }
  0xa0   :  { %168 = vst [vmem:[#allocation8 + $0x10] sm:$0xff] %v164_v32 }
  0xa2   :  { %v145_v33 = vpop.f32.mrf.mxu2  ;;  %v159_v35 = vpop.f32.mrf.mxu3 }
  0xa3   :  { %v146_v34 = vadd.f32 %v145_v33, %v71_v21  ;;  %v160_v36 = vadd.f32 %v159_v35, %v72_v22 }
  0xa5   :  { %v165_v37 = vpack.c.bf16 %v160_v36, %v146_v34 }
  0xa7   :  { %169 = vst [vmem:[#allocation8 + $0x18] sm:$0xff] %v165_v37 }
  0xa8   :  { %182 = dma.vmem_to_hbm [thread:$0]  %s175_s29, 512, %s177_s5, [#allocation4], %s330_s20, %s330_s20, %s331_s21  }
  0xa9   :  { %327 = dma.done.wait [#allocation4], 512  }
  0xaa   :  { %328 = vsyncadd [#allocation4], 4294966784 }
  0xab   :  { %187 = vsyncpa [#allocation3], 1 }
  0xac   :  { %188 = vsyncpa [#allocation6], 1 }
  0xad   :  { %189 = vsyncpa [#allocation4], 1 }

</bundles_post_ra>
